<compile_context>
chip_gen: v5e
topology: v5e:2x2
jax: 0.10.0
libtpu: 0.0.40
codegen_flags: <defaults>
</compile_context>

<pallas_src>
import jax
import jax.numpy as jnp
from jax.experimental import pallas as pl
from jax.experimental.pallas import tpu as pltpu

_LANE = 128
_MIB = 1024 * 1024


def _round_up(x, m):
    return ((x + m - 1) // m) * m


def _vmem_budgets():
    """Generation-aware (block budget for tiling, vmem_limit_bytes)."""
    try:
        info = pltpu.get_tpu_info()
        cap = int(getattr(info, "vmem_capacity_bytes", 128 * _MIB))
    except Exception:
        cap = 64 * _MIB  # conservative (v7x-sized) fallback
    budget = int(min(max(cap // 3, 12 * _MIB), 48 * _MIB))   # v6e/v5e ~42 MiB, v7x ~21 MiB
    limit = int(min(cap * 3 // 4, 96 * _MIB))                # raise scoped VMEM limit
    return budget, limit


def _pick_tile_h(N, H, W, cin_p, cout_p, itemsize, budget_bytes):
    """Largest row-tile T_H whose double-buffered in/out blocks plus in-kernel
    temporaries fit the budget, while keeping >= 4 total grid steps so both v7x
    TensorCores get work and prologue/epilogue DMA stays hidden."""
    in_row = W * cin_p * itemsize                    # one source row of x
    out_row = 2 * W * 2 * cout_p * itemsize          # its two upsampled output rows
    tmp_row = W * cout_p * (4 + 3 * itemsize)        # f32 acc + dtype cast + lane-dup
    fixed = 2 * cin_p * cout_p * itemsize + 2 * cout_p * 4   # dbl-buffered W + bias
    per_row = 2 * (in_row + out_row) + tmp_row       # 2x double buffering on blocks
    max_rows = max(1, int((budget_bytes - fixed) // per_row))
    min_steps = -(-4 // max(N, 1))                   # ceil(4 / N) H-steps wanted
    cap = max(1, H // min_steps) if H >= min_steps else H
    return max(1, min(max_rows, H, cap))


def _upsample_kernel(x_ref, w_ref, b_ref, o_ref):
    # x_ref: (1, T_H, W, Cin_p)          tile of T_H source rows, NHWC
    # w_ref: (Cin_p, Cout_p)             1x1 conv weight with BN scale folded in
    # b_ref: (1, Cout_p)                 folded BN bias (f32)
    # o_ref: (1, T_H, 2, W, 2*Cout_p)    nearest-2x output tile, interleaved layout
    _, t_h, w_dim, cin_p = x_ref.shape
    c2 = o_ref.shape[-1]
    c_out = c2 // 2

    x = x_ref[0].reshape(t_h * w_dim, cin_p)                          # (rows, Cin_p)
    y = jnp.dot(x, w_ref[...], preferred_element_type=jnp.float32)    # MXU matmul
    y = jnp.maximum(y + b_ref[...], 0.0)                              # BN bias + ReLU
    y = y.astype(o_ref.dtype)

    y3 = y.reshape(t_h, w_dim, c_out)                 # (T_H, W, Cout_p)
    # nearest 2x along W: each source pixel becomes [y, y] on the lane axis
    yc = jnp.concatenate([y3, y3], axis=-1)           # (T_H, W, 2*Cout_p)
    # nearest 2x along H: two static-slice stores (no 4x temporary, no concat pass)
    o_ref[0, :, 0, :, :] = yc
    o_ref[0, :, 1, :, :] = yc


def upsample_forward(x_nchw, w, gamma, beta, running_mean, running_var, eps=1e-5):
    """x_nchw: (N, Cin, H, W) -> (N, Cout, 2H, 2W), matching the PyTorch module."""
    N, Cin, H, W = x_nchw.shape
    Cout = w.shape[0]                      # w: (Cout, Cin, 1, 1)
    dtype = x_nchw.dtype
    itemsize = jnp.dtype(dtype).itemsize

    cin_p = _round_up(Cin, _LANE)
    cout_p = _round_up(Cout, _LANE)

    # ---- glue: fold BN into the conv weight (exact: conv has no bias, ReLU after BN)
    scale = gamma / jnp.sqrt(running_var + eps)                    # (Cout,)
    bias = beta - running_mean * scale                             # (Cout,)
    w_mat = jnp.transpose(w.reshape(Cout, Cin) * scale[:, None])   # (Cin, Cout)
    w_mat = jnp.pad(w_mat, ((0, cin_p - Cin), (0, cout_p - Cout))).astype(dtype)
    bias_p = jnp.pad(bias, (0, cout_p - Cout)).reshape(1, cout_p).astype(jnp.float32)

    # ---- glue: NCHW -> NHWC with lane-dense (padded) channels ----
    # TODO(synk): if the surrounding network runs NHWC (or accepts the interleaved
    # padded layout), drop this transpose and the final NCHW transpose / channel
    # un-pad — both are full HBM passes for a mem-bound op.
    x_nhwc = jnp.transpose(x_nchw, (0, 2, 3, 1))                   # (N, H, W, Cin)
    if cin_p != Cin:
        x_nhwc = jnp.pad(x_nhwc, ((0, 0), (0, 0), (0, 0), (0, cin_p - Cin)))

    budget_bytes, vmem_limit = _vmem_budgets()
    t_h = _pick_tile_h(N, H, W, cin_p, cout_p, itemsize, budget_bytes)
    grid = (N, pl.cdiv(H, t_h))

    flops = 2 * N * H * W * cin_p * cout_p
    bytes_accessed = (N * H * W * cin_p * itemsize + cin_p * cout_p * itemsize
                      + cout_p * 4 + N * 2 * H * W * 2 * cout_p * itemsize)

    out = pl.pallas_call(
        _upsample_kernel,
        out_shape=jax.ShapeDtypeStruct((N, H, 2, W, 2 * cout_p), dtype),
        grid_spec=pltpu.PrefetchScalarGridSpec(
            num_scalar_prefetch=0,
            grid=grid,
            in_specs=[
                pl.BlockSpec((1, t_h, W, cin_p), lambda b, h: (b, h, 0, 0)),
                # NOTE: weight/bias index maps are constant; on v7x one could pin
                # them to a single buffer (pipeline_mode=pl.Buffered(1)) to save VMEM.
                pl.BlockSpec((cin_p, cout_p), lambda b, h: (0, 0)),
                pl.BlockSpec((1, cout_p), lambda b, h: (0, 0)),
            ],
            out_specs=pl.BlockSpec((1, t_h, 2, W, 2 * cout_p),
                                   lambda b, h: (b, h, 0, 0, 0)),
        ),
        compiler_params=pltpu.CompilerParams(
            dimension_semantics=("parallel", "parallel"),
            vmem_limit_bytes=vmem_limit),
        cost_estimate=pl.CostEstimate(flops=flops, transcendentals=0,
                                      bytes_accessed=bytes_accessed),
    )(x_nhwc, w_mat, bias_p)

    # ---- glue: free un-interleave (pure reshapes) + channel un-pad + NCHW ----
    # out[n, i, di, j, dj*Cout_p + c] == relu(bn(conv(x)))[n, c, i, j] at (2i+di, 2j+dj)
    out = out.reshape(N, 2 * H, W, 2, cout_p)
    if cout_p != Cout:
        # TODO(synk): for non-128-multiple heads, keep the padded channels flowing
        # into the consumer instead of materializing this 4x-sized slice.
        out = out[..., :Cout]
    out = out.reshape(N, 2 * H, 2 * W, Cout)          # metadata only
    return jnp.transpose(out, (0, 3, 1, 2))           # NCHW to match the PyTorch module


def _reference_forward(x_nchw, w, gamma, beta, running_mean, running_var, eps=1e-5):
    """Pure-JAX reference mirroring the PyTorch module (eval-mode BN)."""
    Cout = w.shape[0]
    w_mat = w.reshape(Cout, -1)
    y = jnp.einsum("nchw,oc->nohw", x_nchw, w_mat)
    scale = gamma / jnp.sqrt(running_var + eps)
    bias = beta - running_mean * scale
    y = y * scale[None, :, None, None] + bias[None, :, None, None]
    y = jnp.maximum(y, 0.0)
    y = jnp.repeat(jnp.repeat(y, 2, axis=2), 2, axis=3)
    return y


if __name__ == "__main__":
    key = jax.random.PRNGKey(0)
    k_x, k_w, k_g, k_b, k_m, k_v = jax.random.split(key, 6)

    N, Cin, Cout, H, W = 2, 8, 16, 16, 16

    x = jax.random.normal(k_x, (N, Cin, H, W), dtype=jnp.float32)
    w = jax.random.normal(k_w, (Cout, Cin, 1, 1), dtype=jnp.float32) * 0.1
    gamma = 1.0 + 0.1 * jax.random.normal(k_g, (Cout,), dtype=jnp.float32)
    beta = 0.1 * jax.random.normal(k_b, (Cout,), dtype=jnp.float32)
    running_mean = 0.1 * jax.random.normal(k_m, (Cout,), dtype=jnp.float32)
    running_var = jnp.abs(1.0 + 0.1 * jax.random.normal(k_v, (Cout,), dtype=jnp.float32))

    fwd = jax.jit(upsample_forward)
    out = jax.block_until_ready(fwd(x, w, gamma, beta, running_mean, running_var))

    ref = _reference_forward(x, w, gamma, beta, running_mean, running_var)
    assert out.shape == (N, Cout, 2 * H, 2 * W), out.shape
    assert jnp.allclose(out, ref, atol=1e-4, rtol=1e-4), float(jnp.max(jnp.abs(out - ref)))

    # Production path: bf16 end-to-end halves the dominant HBM streams (smoke test).
    out_bf16 = jax.block_until_ready(
        fwd(x.astype(jnp.bfloat16), w.astype(jnp.bfloat16),
            gamma, beta, running_mean, running_var))
    assert out_bf16.shape == (N, Cout, 2 * H, 2 * W)
    assert bool(jnp.all(jnp.isfinite(out_bf16.astype(jnp.float32))))

    print("KERNEL_OK")
</pallas_src>

<mosaic_0001>
module attributes {stable_mosaic.version = 11 : i64} {
  func.func @_upsample_kernel(%arg0: i32, %arg1: i32, %arg2: memref<1x8x16x128xf32, #tpu.memory_space<vmem>>, %arg3: memref<128x128xf32, #tpu.memory_space<vmem>>, %arg4: memref<1x128xf32, #tpu.memory_space<vmem>>, %arg5: memref<1x8x2x16x256xf32, #tpu.memory_space<vmem>>) attributes {dimension_semantics = [#tpu.dimension_semantics<parallel>, #tpu.dimension_semantics<parallel>], iteration_bounds = array<i64: 2, 2>, scalar_prefetch = 0 : i64, scratch_operands = 0 : i64, tpu.core_type = #tpu.core_type<tc>, window_params = [{transform_indices = @transform_0, window_bounds = array<i64: 1, 8, 16, 128>}, {pipeline_mode = #tpu.pipeline_mode<synchronous>, transform_indices = @transform_1, window_bounds = array<i64: 128, 128>}, {pipeline_mode = #tpu.pipeline_mode<synchronous>, transform_indices = @transform_2, window_bounds = array<i64: 1, 128>}, {transform_indices = @transform_3, window_bounds = array<i64: 1, 8, 2, 16, 256>}]} {
    %c0 = arith.constant 0 : index
    %c0_0 = arith.constant 0 : index
    %c0_1 = arith.constant 0 : index
    %c0_2 = arith.constant 0 : index
    %0 = vector.load %arg2[%c0, %c0_0, %c0_1, %c0_2] : memref<1x8x16x128xf32, #tpu.memory_space<vmem>>, vector<1x8x16x128xf32>
    %1 = vector.shape_cast %0 : vector<1x8x16x128xf32> to vector<8x16x128xf32>
    %2 = vector.shape_cast %1 : vector<8x16x128xf32> to vector<128x128xf32>
    %c0_3 = arith.constant 0 : index
    %c0_4 = arith.constant 0 : index
    %3 = vector.load %arg3[%c0_3, %c0_4] : memref<128x128xf32, #tpu.memory_space<vmem>>, vector<128x128xf32>
    %cst = arith.constant dense<0.000000e+00> : vector<128x128xf32>
    %4 = tpu.matmul %2, %3, %cst {dimension_numbers = #tpu.dot_dimension_numbers<[1], [0], [0], [1], [0, 0, 1, 1], [], []>} : vector<128x128xf32>, vector<128x128xf32>, vector<128x128xf32> -> vector<128x128xf32>
    %c0_5 = arith.constant 0 : index
    %c0_6 = arith.constant 0 : index
    %5 = vector.load %arg4[%c0_5, %c0_6] : memref<1x128xf32, #tpu.memory_space<vmem>>, vector<1x128xf32>
    %6 = vector.broadcast %5 : vector<1x128xf32> to vector<128x128xf32>
    %7 = arith.addf %4, %6 : vector<128x128xf32>
    %cst_7 = arith.constant 0.000000e+00 : f32
    %8 = vector.broadcast %cst_7 : f32 to vector<128x128xf32>
    %9 = arith.maximumf %7, %8 : vector<128x128xf32>
    %10 = vector.shape_cast %9 : vector<128x128xf32> to vector<8x16x128xf32>
    %11 = tpu.concatenate %10, %10 in 2 : vector<8x16x128xf32>, vector<8x16x128xf32> -> vector<8x16x256xf32>
    %c0_8 = arith.constant 0 : index
    %c0_9 = arith.constant 0 : index
    %c0_10 = arith.constant 0 : index
    %c0_11 = arith.constant 0 : index
    %c0_12 = arith.constant 0 : index
    %12 = vector.load %arg5[%c0_8, %c0_9, %c0_10, %c0_11, %c0_12] : memref<1x8x2x16x256xf32, #tpu.memory_space<vmem>>, vector<1x8x1x16x256xf32>
    %13 = vector.shape_cast %12 : vector<1x8x1x16x256xf32> to vector<8x16x256xf32>
    %14 = vector.shape_cast %11 : vector<8x16x256xf32> to vector<1x8x1x16x256xf32>
    tpu.vector_store %arg5[%c0_8, %c0_9, %c0_10, %c0_11, %c0_12], %14 {strides = array<i32>} : memref<1x8x2x16x256xf32, #tpu.memory_space<vmem>>, vector<1x8x1x16x256xf32>,
    %c0_13 = arith.constant 0 : index
    %c0_14 = arith.constant 0 : index
    %c1 = arith.constant 1 : index
    %c0_15 = arith.constant 0 : index
    %c0_16 = arith.constant 0 : index
    %15 = vector.load %arg5[%c0_13, %c0_14, %c1, %c0_15, %c0_16] : memref<1x8x2x16x256xf32, #tpu.memory_space<vmem>>, vector<1x8x1x16x256xf32>
    %16 = vector.shape_cast %15 : vector<1x8x1x16x256xf32> to vector<8x16x256xf32>
    %17 = vector.shape_cast %11 : vector<8x16x256xf32> to vector<1x8x1x16x256xf32>
    tpu.vector_store %arg5[%c0_13, %c0_14, %c1, %c0_15, %c0_16], %17 {strides = array<i32>} : memref<1x8x2x16x256xf32, #tpu.memory_space<vmem>>, vector<1x8x1x16x256xf32>,
    return
  }
  func.func @transform_0(%arg0: i32, %arg1: i32) -> (i32, i32, i32, i32) {
    %c0_i32 = arith.constant 0 : i32
    %c0_i32_0 = arith.constant 0 : i32
    %c0_i32_1 = arith.constant 0 : i32
    return %arg0, %arg1, %c0_i32, %c0_i32_0 : i32, i32, i32, i32
  }
  func.func @transform_1(%arg0: i32, %arg1: i32) -> (i32, i32) {
    %c0_i32 = arith.constant 0 : i32
    %c0_i32_0 = arith.constant 0 : i32
    %c0_i32_1 = arith.constant 0 : i32
    return %c0_i32, %c0_i32_0 : i32, i32
  }
  func.func @transform_2(%arg0: i32, %arg1: i32) -> (i32, i32) {
    %c0_i32 = arith.constant 0 : i32
    %c0_i32_0 = arith.constant 0 : i32
    %c0_i32_1 = arith.constant 0 : i32
    return %c0_i32, %c0_i32_0 : i32, i32
  }
  func.func @transform_3(%arg0: i32, %arg1: i32) -> (i32, i32, i32, i32, i32) {
    %c0_i32 = arith.constant 0 : i32
    %c0_i32_0 = arith.constant 0 : i32
    %c0_i32_1 = arith.constant 0 : i32
    %c0_i32_2 = arith.constant 0 : i32
    return %arg0, %arg1, %c0_i32, %c0_i32_0, %c0_i32_1 : i32, i32, i32, i32, i32
  }
}

</mosaic_0001>

<bundles_post_ra>
// kernel: upsample_forward.1
= control target key start
LH: loop header
LB: loop body
LE: loop exit
PB: predicated region body
PF: predicated region fallthrough
CT: control target
= control target key end

     0   :  { %s692_s12 = smov 0   ;;  %s694_s13 = smov 0   ;;  %s910_s0 = inlined_call_operand.vmem [shape: f32[2,16,16,128], index: 0, kind: input, shape index: {}]   ;;  %s911_s1 = inlined_call_operand.vmem [shape: f32[128,128], index: 1, kind: input, shape index: {}]   ;;  %s912_s2 = inlined_call_operand.vmem [shape: f32[1,128], index: 2, kind: input, shape index: {}]   ;;  %s913_s3 = inlined_call_operand.vmem [shape: f32[2,16,2,16,256], index: 3, kind: output, shape index: {}]  }
   0x1   :  { %s696_s14 = smov 0   ;;  %s698_s15 = smov 0  }
   0x2   :  { %s700_s16 = smov 0  }
   0x3 LB: > { %s22_s17 = sadd.s32 1, %s662_s14  ;;  %s25_s18 = sadd.s32 1, %s666_s15  ;;  %s670_s16 = sphi %s700_s16, %s13_s16   ;;  %s666_s15 = sphi %s698_s15, %s917_s15   ;;  %s662_s14 = sphi %s696_s14, %s916_s14   ;;  %s658_s13 = sphi %s694_s13, %s915_s13   ;;  %s654_s12 = sphi %s692_s12, %s914_s12  }
   0x4   : > { %p23_p0 = scmp.ge.s32.totalorder %s22_s17, 2  ;;  %p500_p1 = scmp.ge.s32.totalorder %s670_s16, 1 }
   0x5   : > { %p159_p2 = scmp.lt.s32.totalorder %s670_s16, 5 }
   0x6   : > { %s919_s17 = smov (%p23_p0, %s22_s17), 0  ;;  %s921_s18 = smov (!%p23_p0, %s25_s18), %s666_s15 }
   0x7   : > { %p160_p3 = pnand %p500_p1, %p159_p2  ;;  %p27_p4 = scmp.ge.s32.totalorder %s921_s18, 2 }
   0x8   : > { %s501_s23 = sshll.u32 (!%p160_p3), %s654_s12, 3  ;;  %p194_p5 = scmp.lt.s32.totalorder (!%p160_p3), %s658_s13, 1 }
   0x9   : > { %s923_s18 = smov (%p27_p4, %s921_s18), 0  ;;  %163 = sbr.rel (%p160_p3) target bundleno = 242 (0xf2), region = 32 }
   0xa   : > { %p196_p6 = scmp.lt.s32.totalorder (!%p160_p3), %s501_s23, 15 }
   0xe   : > { %v246_v0 = vld [vmem:[%s911_s1 + $0x78] sm:$0xff]  ;;  %v245_v1 = vld [vmem:[%s911_s1 + $0x70] sm:$0xff]  ;;  %v244_v2 = vld [vmem:[%s911_s1 + $0x68] sm:$0xff]  ;;  %s925_s13 = smov (!%p194_p5, %s658_s13), 1  ;;  %s927_s23 = smov (!%p196_p6, %s501_s23), 15 }
   0xf   : > { %544 = vmatpush.msra.mxu2 %v246_v0  ;;  %545 = vmatpush.msra.mxu3 %v246_v0  ;;  %v243_v3 = vld [vmem:[%s911_s1 + $0x60] sm:$0xff]  ;;  %s507_s28 = sshll.u32 %s925_s13, 7  ;;  %s506_s29 = sshll.u32 %s927_s23, 3  ;;  %v242_v4 = vld [vmem:[%s911_s1 + $0x58] sm:$0xff]  ;;  %v241_v5 = vld [vmem:[%s911_s1 + $0x50] sm:$0xff] }
  0x10   : > { %251 = vmatpush.msra.mxu0 %v246_v0  ;;  %543 = vmatpush.msra.mxu1 %v246_v0  ;;  %s746_s5 = sadd.s32 %s507_s28, %s506_s29  ;;  %v240_v6 = vld [vmem:[%s911_s1 + $0x48] sm:$0xff]  ;;  %v239_v7 = vld [vmem:[%s911_s1 + $0x40] sm:$0xff]  ;;  %v238_v8 = vld [vmem:[%s911_s1 + $0x38] sm:$0xff]  ;;  %s502_s22 = sshll.u32 %s927_s23, 1 }
  0x11   : > { %547 = vmatpush.msra.mxu2 %v245_v1  ;;  %548 = vmatpush.msra.mxu3 %v245_v1  ;;  %v237_v9 = vld [vmem:[%s911_s1 + $0x30] sm:$0xff]  ;;  %s503_s24 = sshll.u32 %s925_s13, 5  ;;  %v236_v10 = vld [vmem:[%s911_s1 + $0x28] sm:$0xff]  ;;  %v235_v11 = vld [vmem:[%s911_s1 + $0x20] sm:$0xff] }
  0x12   : > { %252 = vmatpush.msra.mxu0 %v245_v1  ;;  %546 = vmatpush.msra.mxu1 %v245_v1  ;;  %s200_s29 = sadd.s32 %s503_s24, %s502_s22  ;;  %v234_v12 = vld [vmem:[%s911_s1 + $0x18] sm:$0xff]  ;;  %v233_v13 = vld [vmem:[%s911_s1 + $0x10] sm:$0xff]  ;;  %v232_v14 = vld [vmem:[%s911_s1 + $0x8] sm:$0xff]  ;;  %s508_s22 = sshll.u32 %s746_s5, 3 }
  0x13   : > { %550 = vmatpush.msra.mxu2 %v244_v2  ;;  %551 = vmatpush.msra.mxu3 %v244_v2  ;;  %s504_s13 = sshll.u32 %s200_s29, 3  ;;  %v231_v15 = vld [vmem:[%s911_s1] sm:$0xff]  ;;  %s815_s26 = scalar_lea.vmem %s913_s3, %s508_s22 }
  0x14   : > { %253 = vmatpush.msra.mxu0 %v244_v2  ;;  %549 = vmatpush.msra.mxu1 %v244_v2  ;;  %s783_s11 = scalar_lea.vmem %s910_s0, %s504_s13  ;;  %v807_v32 = vld [vmem:[%s912_s2] ss:$0 sm:$0xff] }
  0x15   : > { %553 = vmatpush.msra.mxu2 %v243_v3  ;;  %554 = vmatpush.msra.mxu3 %v243_v3  ;;  %v223_v16 = vld [vmem:[%s783_s11 + $0x40] sm:$0xff]  ;;  %v224_v20 = vld [vmem:[%s783_s11 + $0x48] sm:$0xff]  ;;  %v225_v24 = vld [vmem:[%s783_s11 + $0x50] sm:$0xff] }
  0x16   : > { %254 = vmatpush.msra.mxu0 %v243_v3  ;;  %552 = vmatpush.msra.mxu1 %v243_v3  ;;  %v227_v17 = vld [vmem:[%s783_s11 + $0x60] sm:$0xff]  ;;  %v228_v21 = vld [vmem:[%s783_s11 + $0x68] sm:$0xff]  ;;  %v229_v25 = vld [vmem:[%s783_s11 + $0x70] sm:$0xff] }
  0x17   : > { %556 = vmatpush.msra.mxu2 %v242_v4  ;;  %557 = vmatpush.msra.mxu3 %v242_v4  ;;  %v215_v18 = vld [vmem:[%s783_s11] sm:$0xff]  ;;  %v216_v22 = vld [vmem:[%s783_s11 + $0x8] sm:$0xff]  ;;  %v217_v26 = vld [vmem:[%s783_s11 + $0x10] sm:$0xff] }
  0x18   : > { %255 = vmatpush.msra.mxu0 %v242_v4  ;;  %555 = vmatpush.msra.mxu1 %v242_v4  ;;  %v219_v19 = vld [vmem:[%s783_s11 + $0x20] sm:$0xff]  ;;  %v220_v23 = vld [vmem:[%s783_s11 + $0x28] sm:$0xff]  ;;  %v221_v27 = vld [vmem:[%s783_s11 + $0x30] sm:$0xff] }
  0x19   : > { %559 = vmatpush.msra.mxu2 %v241_v5  ;;  %560 = vmatpush.msra.mxu3 %v241_v5  ;;  %v226_v28 = vld [vmem:[%s783_s11 + $0x58] sm:$0xff] }
  0x1a   : > { %256 = vmatpush.msra.mxu0 %v241_v5  ;;  %558 = vmatpush.msra.mxu1 %v241_v5  ;;  %v230_v29 = vld [vmem:[%s783_s11 + $0x78] sm:$0xff] }
  0x1b   : > { %562 = vmatpush.msra.mxu2 %v240_v6  ;;  %563 = vmatpush.msra.mxu3 %v240_v6  ;;  %v218_v30 = vld [vmem:[%s783_s11 + $0x18] sm:$0xff] }
  0x1c   : > { %257 = vmatpush.msra.mxu0 %v240_v6  ;;  %561 = vmatpush.msra.mxu1 %v240_v6  ;;  %v222_v31 = vld [vmem:[%s783_s11 + $0x38] sm:$0xff] }
  0x1d   : > { %565 = vmatpush.msra.mxu2 %v239_v7  ;;  %566 = vmatpush.msra.mxu3 %v239_v7 }
  0x1e   : > { %258 = vmatpush.msra.mxu0 %v239_v7  ;;  %564 = vmatpush.msra.mxu1 %v239_v7 }
  0x1f   : > { %568 = vmatpush.msra.mxu2 %v238_v8  ;;  %569 = vmatpush.msra.mxu3 %v238_v8 }
  0x20   : > { %259 = vmatpush.msra.mxu0 %v238_v8  ;;  %567 = vmatpush.msra.mxu1 %v238_v8 }
  0x21   : > { %571 = vmatpush.msra.mxu2 %v237_v9  ;;  %572 = vmatpush.msra.mxu3 %v237_v9 }
  0x22   : > { %260 = vmatpush.msra.mxu0 %v237_v9  ;;  %570 = vmatpush.msra.mxu1 %v237_v9 }
  0x23   : > { %574 = vmatpush.msra.mxu2 %v236_v10  ;;  %575 = vmatpush.msra.mxu3 %v236_v10 }
  0x24   : > { %261 = vmatpush.msra.mxu0 %v236_v10  ;;  %573 = vmatpush.msra.mxu1 %v236_v10 }
  0x25   : > { %577 = vmatpush.msra.mxu2 %v235_v11  ;;  %578 = vmatpush.msra.mxu3 %v235_v11 }
  0x26   : > { %262 = vmatpush.msra.mxu0 %v235_v11  ;;  %576 = vmatpush.msra.mxu1 %v235_v11 }
  0x27   : > { %580 = vmatpush.msra.mxu2 %v234_v12  ;;  %581 = vmatpush.msra.mxu3 %v234_v12 }
  0x28   : > { %263 = vmatpush.msra.mxu0 %v234_v12  ;;  %579 = vmatpush.msra.mxu1 %v234_v12 }
  0x29   : > { %583 = vmatpush.msra.mxu2 %v233_v13  ;;  %584 = vmatpush.msra.mxu3 %v233_v13 }
  0x2a   : > { %264 = vmatpush.msra.mxu0 %v233_v13  ;;  %582 = vmatpush.msra.mxu1 %v233_v13 }
  0x2b   : > { %586 = vmatpush.msra.mxu2 %v232_v14  ;;  %587 = vmatpush.msra.mxu3 %v232_v14 }
  0x2c   : > { %265 = vmatpush.msra.mxu0 %v232_v14  ;;  %585 = vmatpush.msra.mxu1 %v232_v14 }
  0x2d   : > { %589 = vmatpush.msra.mxu2 %v231_v15  ;;  %590 = vmatpush.msra.mxu3 %v231_v15 }
  0x2e   : > { %291 = vmatmul.f32.vlgmr.msra.gmra.mxu2 %v223_v16  ;;  %303 = vmatmul.f32.vlgmr.msra.gmra.mxu3 %v227_v17 }
  0x2f   : > { %266 = vmatpush.msra.mxu0 %v231_v15  ;;  %588 = vmatpush.msra.mxu1 %v231_v15 }
  0x30   : > { %267 = vmatmul.f32.vlgmr.msra.gmra.mxu0 %v215_v18  ;;  %279 = vmatmul.f32.vlgmr.msra.gmra.mxu1 %v219_v19 }
  0x36   : > { %294 = vmatmul.f32.gmra.mxu2 %v224_v20  ;;  %306 = vmatmul.f32.gmra.mxu3 %v228_v21 }
  0x38   : > { %270 = vmatmul.f32.gmra.mxu0 %v216_v22  ;;  %282 = vmatmul.f32.gmra.mxu1 %v220_v23 }
  0x3e   : > { %297 = vmatmul.f32.gmra.mxu2 %v225_v24  ;;  %309 = vmatmul.f32.gmra.mxu3 %v229_v25 }
  0x40   : > { %273 = vmatmul.f32.gmra.mxu0 %v217_v26  ;;  %285 = vmatmul.f32.gmra.mxu1 %v221_v27 }
  0x46   : > { %300 = vmatmul.f32.gmra.mxu2 %v226_v28  ;;  %312 = vmatmul.f32.gmra.mxu3 %v230_v29 }
  0x48   : > { %276 = vmatmul.f32.gmra.mxu0 %v218_v30  ;;  %288 = vmatmul.f32.gmra.mxu1 %v222_v31 }
  0xad   : > { %v268_v33 = vpop.f32.mrf.mxu0  ;;  %v280_v34 = vpop.f32.mrf.mxu1 }
  0xae   : > { %v269_v35 = vadd.f32 %v807_v32, %v268_v33  ;;  %v281_v36 = vadd.f32 %v807_v32, %v280_v34 }
  0xb0   : > { %v316_v37 = vmax.f32 %v269_v35, 0.0  ;;  %v320_v39 = vmax.f32 %v281_v36, 0.0 }
  0xb1   : > { %v292_v38 = vpop.f32.mrf.mxu2  ;;  %v304_v41 = vpop.f32.mrf.mxu3 }
  0xb2   : > { %332 = vst [vmem:[%s815_s26] sm:$0xff] %v316_v37  ;;  %v293_v40 = vadd.f32 %v807_v32, %v292_v38  ;;  %v305_v43 = vadd.f32 %v807_v32, %v304_v41 }
  0xb3   : > { %333 = vst [vmem:[%s815_s26 + $0x8] sm:$0xff] %v316_v37 }
  0xb4   : > { %509 = vst [vmem:[%s815_s26 + $0x20] sm:$0xff] %v316_v37  ;;  %v324_v42 = vmax.f32 %v293_v40, 0.0  ;;  %v328_v45 = vmax.f32 %v305_v43, 0.0 }
  0xb5   : > { %510 = vst [vmem:[%s815_s26 + $0x28] sm:$0xff] %v316_v37  ;;  %v271_v44 = vpop.f32.mrf.mxu0  ;;  %v283_v47 = vpop.f32.mrf.mxu1 }
  0xb6   : > { %340 = vst [vmem:[%s815_s26 + $0x80] sm:$0xff] %v320_v39  ;;  %v272_v46 = vadd.f32 %v807_v32, %v271_v44  ;;  %v284_v49 = vadd.f32 %v807_v32, %v283_v47 }
  0xb7   : > { %341 = vst [vmem:[%s815_s26 + $0x88] sm:$0xff] %v320_v39 }
  0xb8   : > { %517 = vst [vmem:[%s815_s26 + $0xa0] sm:$0xff] %v320_v39  ;;  %v317_v48 = vmax.f32 %v272_v46, 0.0  ;;  %v321_v51 = vmax.f32 %v284_v49, 0.0 }
  0xb9   : > { %518 = vst [vmem:[%s815_s26 + $0xa8] sm:$0xff] %v320_v39  ;;  %v295_v50 = vpop.f32.mrf.mxu2  ;;  %v307_v53 = vpop.f32.mrf.mxu3 }
  0xba   : > { %348 = vst [vmem:[%s815_s26 + $0x100] sm:$0xff] %v324_v42  ;;  %v296_v52 = vadd.f32 %v807_v32, %v295_v50  ;;  %v308_v55 = vadd.f32 %v807_v32, %v307_v53 }
  0xbb   : > { %349 = vst [vmem:[%s815_s26 + $0x108] sm:$0xff] %v324_v42 }
  0xbc   : > { %525 = vst [vmem:[%s815_s26 + $0x120] sm:$0xff] %v324_v42  ;;  %v325_v54 = vmax.f32 %v296_v52, 0.0  ;;  %v329_v57 = vmax.f32 %v308_v55, 0.0 }
  0xbd   : > { %526 = vst [vmem:[%s815_s26 + $0x128] sm:$0xff] %v324_v42  ;;  %v274_v56 = vpop.f32.mrf.mxu0  ;;  %v286_v59 = vpop.f32.mrf.mxu1 }
  0xbe   : > { %356 = vst [vmem:[%s815_s26 + $0x180] sm:$0xff] %v328_v45  ;;  %v275_v58 = vadd.f32 %v807_v32, %v274_v56  ;;  %v287_v61 = vadd.f32 %v807_v32, %v286_v59 }
  0xbf   : > { %357 = vst [vmem:[%s815_s26 + $0x188] sm:$0xff] %v328_v45 }
  0xc0   : > { %533 = vst [vmem:[%s815_s26 + $0x1a0] sm:$0xff] %v328_v45  ;;  %v318_v60 = vmax.f32 %v275_v58, 0.0  ;;  %v322_v63 = vmax.f32 %v287_v61, 0.0 }
  0xc1   : > { %534 = vst [vmem:[%s815_s26 + $0x1a8] sm:$0xff] %v328_v45  ;;  %v298_v62 = vpop.f32.mrf.mxu2  ;;  %v310_v1 = vpop.f32.mrf.mxu3 }
  0xc2   : > { %334 = vst [vmem:[%s815_s26 + $0x10] sm:$0xff] %v317_v48  ;;  %v299_v0 = vadd.f32 %v807_v32, %v298_v62  ;;  %v311_v3 = vadd.f32 %v807_v32, %v310_v1 }
  0xc3   : > { %335 = vst [vmem:[%s815_s26 + $0x18] sm:$0xff] %v317_v48 }
  0xc4   : > { %511 = vst [vmem:[%s815_s26 + $0x30] sm:$0xff] %v317_v48  ;;  %v326_v2 = vmax.f32 %v299_v0, 0.0  ;;  %v330_v5 = vmax.f32 %v311_v3, 0.0 }
  0xc5   : > { %512 = vst [vmem:[%s815_s26 + $0x38] sm:$0xff] %v317_v48  ;;  %v277_v4 = vpop.f32.mrf.mxu0  ;;  %v289_v7 = vpop.f32.mrf.mxu1 }
  0xc6   : > { %342 = vst [vmem:[%s815_s26 + $0x90] sm:$0xff] %v321_v51  ;;  %v278_v6 = vadd.f32 %v807_v32, %v277_v4  ;;  %v290_v9 = vadd.f32 %v807_v32, %v289_v7 }
  0xc7   : > { %343 = vst [vmem:[%s815_s26 + $0x98] sm:$0xff] %v321_v51 }
  0xc8   : > { %519 = vst [vmem:[%s815_s26 + $0xb0] sm:$0xff] %v321_v51  ;;  %v319_v8 = vmax.f32 %v278_v6, 0.0  ;;  %v323_v11 = vmax.f32 %v290_v9, 0.0 }
  0xc9   : > { %520 = vst [vmem:[%s815_s26 + $0xb8] sm:$0xff] %v321_v51  ;;  %v301_v10 = vpop.f32.mrf.mxu2  ;;  %v313_v13 = vpop.f32.mrf.mxu3 }
  0xca   : > { %350 = vst [vmem:[%s815_s26 + $0x110] sm:$0xff] %v325_v54  ;;  %v302_v12 = vadd.f32 %v807_v32, %v301_v10  ;;  %v314_v15 = vadd.f32 %v807_v32, %v313_v13 }
  0xcb   : > { %351 = vst [vmem:[%s815_s26 + $0x118] sm:$0xff] %v325_v54 }
  0xcc   : > { %527 = vst [vmem:[%s815_s26 + $0x130] sm:$0xff] %v325_v54  ;;  %v327_v14 = vmax.f32 %v302_v12, 0.0  ;;  %v331_v16 = vmax.f32 %v314_v15, 0.0 }
  0xcd   : > { %528 = vst [vmem:[%s815_s26 + $0x138] sm:$0xff] %v325_v54 }
  0xce   : > { %358 = vst [vmem:[%s815_s26 + $0x190] sm:$0xff] %v329_v57 }
  0xcf   : > { %359 = vst [vmem:[%s815_s26 + $0x198] sm:$0xff] %v329_v57 }
  0xd0   : > { %535 = vst [vmem:[%s815_s26 + $0x1b0] sm:$0xff] %v329_v57 }
  0xd1   : > { %536 = vst [vmem:[%s815_s26 + $0x1b8] sm:$0xff] %v329_v57 }
  0xd2   : > { %336 = vst [vmem:[%s815_s26 + $0x40] sm:$0xff] %v318_v60 }
  0xd3   : > { %337 = vst [vmem:[%s815_s26 + $0x48] sm:$0xff] %v318_v60 }
  0xd4   : > { %513 = vst [vmem:[%s815_s26 + $0x60] sm:$0xff] %v318_v60 }
  0xd5   : > { %514 = vst [vmem:[%s815_s26 + $0x68] sm:$0xff] %v318_v60 }
  0xd6   : > { %344 = vst [vmem:[%s815_s26 + $0xc0] sm:$0xff] %v322_v63 }
  0xd7   : > { %345 = vst [vmem:[%s815_s26 + $0xc8] sm:$0xff] %v322_v63 }
  0xd8   : > { %521 = vst [vmem:[%s815_s26 + $0xe0] sm:$0xff] %v322_v63 }
  0xd9   : > { %522 = vst [vmem:[%s815_s26 + $0xe8] sm:$0xff] %v322_v63 }
  0xda   : > { %352 = vst [vmem:[%s815_s26 + $0x140] sm:$0xff] %v326_v2 }
  0xdb   : > { %353 = vst [vmem:[%s815_s26 + $0x148] sm:$0xff] %v326_v2 }
  0xdc   : > { %529 = vst [vmem:[%s815_s26 + $0x160] sm:$0xff] %v326_v2 }
  0xdd   : > { %530 = vst [vmem:[%s815_s26 + $0x168] sm:$0xff] %v326_v2 }
  0xde   : > { %360 = vst [vmem:[%s815_s26 + $0x1c0] sm:$0xff] %v330_v5 }
  0xdf   : > { %361 = vst [vmem:[%s815_s26 + $0x1c8] sm:$0xff] %v330_v5 }
  0xe0   : > { %537 = vst [vmem:[%s815_s26 + $0x1e0] sm:$0xff] %v330_v5 }
  0xe1   : > { %538 = vst [vmem:[%s815_s26 + $0x1e8] sm:$0xff] %v330_v5 }
  0xe2   : > { %338 = vst [vmem:[%s815_s26 + $0x50] sm:$0xff] %v319_v8 }
  0xe3   : > { %339 = vst [vmem:[%s815_s26 + $0x58] sm:$0xff] %v319_v8 }
  0xe4   : > { %515 = vst [vmem:[%s815_s26 + $0x70] sm:$0xff] %v319_v8 }
  0xe5   : > { %516 = vst [vmem:[%s815_s26 + $0x78] sm:$0xff] %v319_v8 }
  0xe6   : > { %346 = vst [vmem:[%s815_s26 + $0xd0] sm:$0xff] %v323_v11 }
  0xe7   : > { %347 = vst [vmem:[%s815_s26 + $0xd8] sm:$0xff] %v323_v11 }
  0xe8   : > { %523 = vst [vmem:[%s815_s26 + $0xf0] sm:$0xff] %v323_v11 }
  0xe9   : > { %524 = vst [vmem:[%s815_s26 + $0xf8] sm:$0xff] %v323_v11 }
  0xea   : > { %354 = vst [vmem:[%s815_s26 + $0x150] sm:$0xff] %v327_v14 }
  0xeb   : > { %355 = vst [vmem:[%s815_s26 + $0x158] sm:$0xff] %v327_v14 }
  0xec   : > { %531 = vst [vmem:[%s815_s26 + $0x170] sm:$0xff] %v327_v14 }
  0xed   : > { %532 = vst [vmem:[%s815_s26 + $0x178] sm:$0xff] %v327_v14 }
  0xee   : > { %362 = vst [vmem:[%s815_s26 + $0x1d0] sm:$0xff] %v331_v16 }
  0xef   : > { %363 = vst [vmem:[%s815_s26 + $0x1d8] sm:$0xff] %v331_v16 }
  0xf0   : > { %539 = vst [vmem:[%s815_s26 + $0x1f0] sm:$0xff] %v331_v16 }
  0xf1   : > { %540 = vst [vmem:[%s815_s26 + $0x1f8] sm:$0xff] %v331_v16 }
  0xf2 PF: > { %s13_s16 = sadd.s32 1, %s670_s16   ;;  %s914_s12 = smov %s662_s14 }
  0xf3   : > { %p10_p7 = scmp.ge.s32.totalorder %s13_s16, 6   ;;  %s915_s13 = smov %s666_s15 }
  0xf4   : > { %s916_s14 = smov %s919_s17  ;;  %s917_s15 = smov %s923_s18 }
  0xf5   :  { %12 = sbr.rel (!%p10_p7) target bundleno = 3 (0x3), region = 63 }

</bundles_post_ra>
